<compile_context>
chip_gen: v7x
topology: tpu7x:2x2x1
jax: 0.10.0
libtpu: 0.0.40
codegen_flags: <defaults>
</compile_context>

<pallas_src>
import numpy as np
import jax
import jax.numpy as jnp
from jax import lax
from jax.experimental import pallas as pl
from jax.experimental.pallas import tpu as pltpu


def _make_kernel(d0, d1, d2, d3, y_w):
    """Kernel for x:(d0, d1*d2*d3), y:(-1, H*y_w), z:(n0, -1), w:(120, -1)."""
    D23 = d2 * d3                      # 48  (flat col c = i1*D23 + i2*d3 + i3)
    W = d1 * D23                       # 624
    y_shift = 4 * y_w - 6              # dst col - src col for the y update

    def kernel(x_ref, y_ref, z_ref, w_ref, xo_ref, yo_ref, zo_ref, wo_ref):
        # -------- column-class masks on the flat x columns (bit tricks) -----
        cc = lax.broadcasted_iota(jnp.int32, (1, W), 1)
        i3_even = (cc & 1) == 0                      # i3 even   (d3 == 8)
        i2_even = (cc & d3) == 0                     # i2 even   (d3 == 8, d2 even)
        i2_is_3 = cc < 0                             # i2 == 3 (any i3)
        for b in range(d1):
            base = b * D23 + 3 * d3
            i2_is_3 = i2_is_3 | ((cc >= base) & (cc < base + d3))
        m3e = i2_is_3 & i3_even                      # columns of x[:, :, 3, ::2]
        col11 = (cc >= 11 * D23) & (cc < 12 * D23)   # i1 == 11  (the "xxx" view)

        X0 = x_ref[...]                              # (d0, W)

        # -------- row-8 ("xx" view) replay on a (1, W) slice -----------------
        A = X0[8:9, :] + 1.0                                       # x[2:10] += 1
        # xx[..., 1] = xx[..., -1] * 3   (col 8b+1 <- col 8b+7, same 8-block)
        A = jnp.where((cc & 7) == 1, pltpu.roll(A, W - 6, axis=1) * 3.0, A)
        A1 = A                                                     # x1[8]
        # clamp on x[8,:,3,::2] is dead (overwritten just below); the in-place
        # exp on x[8,:,4,1::2] is dead (overwritten by the pow on even i2).
        # xx[:, 3, ::2] = exp(xx[:, 4, 1::2])   (flat: col c <- exp(col c+9))
        A = jnp.where(m3e, jnp.exp(pltpu.roll(A, W - 9, axis=1)), A)
        A = jnp.where(i2_even, A1 * A1, A)                         # x[:,:,::2,:] = x1**2
        if 2 <= 8 < d0 - 1:                                        # row 8 inside x[2:-1]
            A = jnp.where(col11, A * 0.5, A)                       # xxx /= 2

        # -------- bulk chain (rows != 8; row 8 overwritten by the fold) ------
        rr = lax.broadcasted_iota(jnp.int32, (d0, W), 0)
        X = jnp.where((rr >= 2) & (rr < 10), X0 + 1.0, X0)         # x[2:10] += 1
        X1 = X                                                     # x1 (rows != 8)
        X = jnp.where(m3e, jnp.clip(X, 0.0, 0.5), X)               # clamp x[:,:,3,::2]
        X = jnp.where(i2_even, X1 * X1, X)                         # x[:,:,::2,:] = x1**2
        X = jnp.where((rr >= 2) & (rr < d0 - 1) & col11, X * 0.5, X)   # xxx /= 2

        # single lane-dense store, row 8 folded in
        xo_ref[...] = jnp.where(rr == 8, A, X)

        # -------- y : y[..., -1, -5:-1] = y[..., -4, 1:5] - 11 ----------------
        Y = y_ref[...]
        HW = Y.shape[1]
        yc = lax.broadcasted_iota(jnp.int32, Y.shape, 1)
        Yr = pltpu.roll(Y, y_shift, axis=1)          # Yr[c] = Y[c - y_shift]
        yo_ref[...] = jnp.where((yc >= HW - 5) & (yc < HW - 1), Yr - 11.0, Y)

        # -------- z : z[:1] = z[-1:] * z[3:4] ---------------------------------
        Z = z_ref[...]
        n0 = Z.shape[0]
        zr = lax.broadcasted_iota(jnp.int32, Z.shape, 0)
        zo_ref[...] = jnp.where(zr == 0, Z[n0 - 1:n0, :] * Z[3:4, :], Z)

        # -------- w : w[80::2] = w[4:84:4] + 23 -------------------------------
        # In-kernel static row copies (RHS read from the *input* ref, i.e.
        # pre-assignment values), replacing the wrapper-side permutation.
        wo_ref[...] = w_ref[...]
        for i in range(20):
            dst = 80 + 2 * i
            src = 4 + 4 * i
            wo_ref[dst:dst + 1, :] = w_ref[src:src + 1, :] + 23.0

    return kernel


@jax.jit
def model_forward(x, y, z, w):
    d0, d1, d2, d3 = x.shape
    assert d3 == 8 and d2 % 2 == 0 and d2 >= 5, "kernel specialised: d3 == 8, d2 even >= 5"
    assert d0 >= 9 and d1 >= 12, "forward() indexes x[8] and x[:, 11]"
    assert y.shape[-1] >= 5 and y.shape[-2] >= 4
    assert z.shape[0] >= 4
    assert w.ndim == 2 and w.shape[0] == 120, "w[80::2] / w[4:84:4] must both give 20 rows"

    # Layout plumbing only: lane-dense 2-D views (bitcast reshapes, no gathers).
    x2 = x.reshape(d0, d1 * d2 * d3)
    y2 = y.reshape(-1, y.shape[-2] * y.shape[-1])
    z2 = z.reshape(z.shape[0], -1)

    vmem = lambda: pl.BlockSpec(memory_space=pltpu.MemorySpace.VMEM)
    xo, yo, zo, wo = pl.pallas_call(
        _make_kernel(d0, d1, d2, d3, y.shape[-1]),
        out_shape=(
            jax.ShapeDtypeStruct(x2.shape, x.dtype),
            jax.ShapeDtypeStruct(y2.shape, y.dtype),
            jax.ShapeDtypeStruct(z2.shape, z.dtype),
            jax.ShapeDtypeStruct(w.shape, w.dtype),
        ),
        in_specs=[vmem(), vmem(), vmem(), vmem()],
        out_specs=(vmem(), vmem(), vmem(), vmem()),
    )(x2, y2, z2, w)

    return (xo.reshape(x.shape), yo.reshape(y.shape), zo.reshape(z.shape), wo)


def _reference(x, y, z, w):
    """NumPy mirror of the torch forward (views/in-place semantics identical)."""
    x = x.copy(); y = y.copy(); z = z.copy(); w = w.copy()
    xx = x[8]
    x[2:10, ...] += 1
    xx[..., 1] = xx[..., -1] * 3
    x1 = x.copy()
    xxx = x[2:-1, 11, ...]
    v = x[:, :, 3, ::2]
    np.clip(v, 0, 0.5, out=v)
    t = xx[:, 4, 1::2]
    np.exp(t, out=t)
    xx[:, 3, ::2] = t
    x[:, :, ::2, :] = x1[:, :, ::2, :] ** 2
    xxx[:, :, :] /= 2
    y[..., -1, -5:-1] = y[..., -4, 1:5] - 11
    z[:1] = z[-1:] * z[3:4]
    w[80::2] = w[4:84:4] + 23
    return x, y, z, w


if __name__ == "__main__":
    key = jax.random.PRNGKey(0)
    kx, ky, kz, kw = jax.random.split(key, 4)
    # Small shapes consistent with the slicing in forward():
    #   x: dim0>=9, dim1>=12, dim2>=5 (even), dim3 == 8
    #   w: 80::2 and 4:84:4 must both give 20 rows -> 120 rows
    x = jax.random.uniform(kx, (12, 13, 6, 8), dtype=jnp.float32)
    y = jax.random.uniform(ky, (2, 3, 6, 8), dtype=jnp.float32)
    z = jax.random.uniform(kz, (6, 4, 8), dtype=jnp.float32)
    w = jax.random.uniform(kw, (120, 8), dtype=jnp.float32)

    outs = jax.block_until_ready(model_forward(x, y, z, w))

    refs = _reference(np.asarray(x), np.asarray(y), np.asarray(z), np.asarray(w))
    for got, want in zip(outs, refs):
        np.testing.assert_allclose(np.asarray(got), want, rtol=1e-5, atol=1e-5)

    print("KERNEL_OK")
</pallas_src>

<mosaic_0001>
module attributes {stable_mosaic.version = 11 : i64} {
  func.func @kernel(%arg0: memref<12x624xf32, #tpu.memory_space<vmem>>, %arg1: memref<6x48xf32, #tpu.memory_space<vmem>>, %arg2: memref<6x32xf32, #tpu.memory_space<vmem>>, %arg3: memref<120x8xf32, #tpu.memory_space<vmem>>, %arg4: memref<12x624xf32, #tpu.memory_space<vmem>>, %arg5: memref<6x48xf32, #tpu.memory_space<vmem>>, %arg6: memref<6x32xf32, #tpu.memory_space<vmem>>, %arg7: memref<120x8xf32, #tpu.memory_space<vmem>>) attributes {dimension_semantics = [], scalar_prefetch = 0 : i64, scratch_operands = 0 : i64, tpu.core_type = #tpu.core_type<tc>} {
    %0 = tpu.iota {dimensions = array<i32: 1>} : vector<1x624xi32>
    %c1_i32 = arith.constant 1 : i32
    %1 = vector.broadcast %c1_i32 : i32 to vector<1x624xi32>
    %2 = arith.andi %0, %1 : vector<1x624xi32>
    %c0_i32 = arith.constant 0 : i32
    %3 = vector.broadcast %c0_i32 : i32 to vector<1x624xi32>
    %4 = arith.cmpi eq, %2, %3 : vector<1x624xi32>
    %c8_i32 = arith.constant 8 : i32
    %5 = vector.broadcast %c8_i32 : i32 to vector<1x624xi32>
    %6 = arith.andi %0, %5 : vector<1x624xi32>
    %c0_i32_0 = arith.constant 0 : i32
    %7 = vector.broadcast %c0_i32_0 : i32 to vector<1x624xi32>
    %8 = arith.cmpi eq, %6, %7 : vector<1x624xi32>
    %c0_i32_1 = arith.constant 0 : i32
    %9 = vector.broadcast %c0_i32_1 : i32 to vector<1x624xi32>
    %10 = arith.cmpi slt, %0, %9 : vector<1x624xi32>
    %c24_i32 = arith.constant 24 : i32
    %11 = vector.broadcast %c24_i32 : i32 to vector<1x624xi32>
    %12 = arith.cmpi sge, %0, %11 : vector<1x624xi32>
    %c32_i32 = arith.constant 32 : i32
    %13 = vector.broadcast %c32_i32 : i32 to vector<1x624xi32>
    %14 = arith.cmpi slt, %0, %13 : vector<1x624xi32>
    %15 = arith.andi %12, %14 : vector<1x624xi1>
    %16 = arith.ori %10, %15 : vector<1x624xi1>
    %c72_i32 = arith.constant 72 : i32
    %17 = vector.broadcast %c72_i32 : i32 to vector<1x624xi32>
    %18 = arith.cmpi sge, %0, %17 : vector<1x624xi32>
    %c80_i32 = arith.constant 80 : i32
    %19 = vector.broadcast %c80_i32 : i32 to vector<1x624xi32>
    %20 = arith.cmpi slt, %0, %19 : vector<1x624xi32>
    %21 = arith.andi %18, %20 : vector<1x624xi1>
    %22 = arith.ori %16, %21 : vector<1x624xi1>
    %c120_i32 = arith.constant 120 : i32
    %23 = vector.broadcast %c120_i32 : i32 to vector<1x624xi32>
    %24 = arith.cmpi sge, %0, %23 : vector<1x624xi32>
    %c128_i32 = arith.constant 128 : i32
    %25 = vector.broadcast %c128_i32 : i32 to vector<1x624xi32>
    %26 = arith.cmpi slt, %0, %25 : vector<1x624xi32>
    %27 = arith.andi %24, %26 : vector<1x624xi1>
    %28 = arith.ori %22, %27 : vector<1x624xi1>
    %c168_i32 = arith.constant 168 : i32
    %29 = vector.broadcast %c168_i32 : i32 to vector<1x624xi32>
    %30 = arith.cmpi sge, %0, %29 : vector<1x624xi32>
    %c176_i32 = arith.constant 176 : i32
    %31 = vector.broadcast %c176_i32 : i32 to vector<1x624xi32>
    %32 = arith.cmpi slt, %0, %31 : vector<1x624xi32>
    %33 = arith.andi %30, %32 : vector<1x624xi1>
    %34 = arith.ori %28, %33 : vector<1x624xi1>
    %c216_i32 = arith.constant 216 : i32
    %35 = vector.broadcast %c216_i32 : i32 to vector<1x624xi32>
    %36 = arith.cmpi sge, %0, %35 : vector<1x624xi32>
    %c224_i32 = arith.constant 224 : i32
    %37 = vector.broadcast %c224_i32 : i32 to vector<1x624xi32>
    %38 = arith.cmpi slt, %0, %37 : vector<1x624xi32>
    %39 = arith.andi %36, %38 : vector<1x624xi1>
    %40 = arith.ori %34, %39 : vector<1x624xi1>
    %c264_i32 = arith.constant 264 : i32
    %41 = vector.broadcast %c264_i32 : i32 to vector<1x624xi32>
    %42 = arith.cmpi sge, %0, %41 : vector<1x624xi32>
    %c272_i32 = arith.constant 272 : i32
    %43 = vector.broadcast %c272_i32 : i32 to vector<1x624xi32>
    %44 = arith.cmpi slt, %0, %43 : vector<1x624xi32>
    %45 = arith.andi %42, %44 : vector<1x624xi1>
    %46 = arith.ori %40, %45 : vector<1x624xi1>
    %c312_i32 = arith.constant 312 : i32
    %47 = vector.broadcast %c312_i32 : i32 to vector<1x624xi32>
    %48 = arith.cmpi sge, %0, %47 : vector<1x624xi32>
    %c320_i32 = arith.constant 320 : i32
    %49 = vector.broadcast %c320_i32 : i32 to vector<1x624xi32>
    %50 = arith.cmpi slt, %0, %49 : vector<1x624xi32>
    %51 = arith.andi %48, %50 : vector<1x624xi1>
    %52 = arith.ori %46, %51 : vector<1x624xi1>
    %c360_i32 = arith.constant 360 : i32
    %53 = vector.broadcast %c360_i32 : i32 to vector<1x624xi32>
    %54 = arith.cmpi sge, %0, %53 : vector<1x624xi32>
    %c368_i32 = arith.constant 368 : i32
    %55 = vector.broadcast %c368_i32 : i32 to vector<1x624xi32>
    %56 = arith.cmpi slt, %0, %55 : vector<1x624xi32>
    %57 = arith.andi %54, %56 : vector<1x624xi1>
    %58 = arith.ori %52, %57 : vector<1x624xi1>
    %c408_i32 = arith.constant 408 : i32
    %59 = vector.broadcast %c408_i32 : i32 to vector<1x624xi32>
    %60 = arith.cmpi sge, %0, %59 : vector<1x624xi32>
    %c416_i32 = arith.constant 416 : i32
    %61 = vector.broadcast %c416_i32 : i32 to vector<1x624xi32>
    %62 = arith.cmpi slt, %0, %61 : vector<1x624xi32>
    %63 = arith.andi %60, %62 : vector<1x624xi1>
    %64 = arith.ori %58, %63 : vector<1x624xi1>
    %c456_i32 = arith.constant 456 : i32
    %65 = vector.broadcast %c456_i32 : i32 to vector<1x624xi32>
    %66 = arith.cmpi sge, %0, %65 : vector<1x624xi32>
    %c464_i32 = arith.constant 464 : i32
    %67 = vector.broadcast %c464_i32 : i32 to vector<1x624xi32>
    %68 = arith.cmpi slt, %0, %67 : vector<1x624xi32>
    %69 = arith.andi %66, %68 : vector<1x624xi1>
    %70 = arith.ori %64, %69 : vector<1x624xi1>
    %c504_i32 = arith.constant 504 : i32
    %71 = vector.broadcast %c504_i32 : i32 to vector<1x624xi32>
    %72 = arith.cmpi sge, %0, %71 : vector<1x624xi32>
    %c512_i32 = arith.constant 512 : i32
    %73 = vector.broadcast %c512_i32 : i32 to vector<1x624xi32>
    %74 = arith.cmpi slt, %0, %73 : vector<1x624xi32>
    %75 = arith.andi %72, %74 : vector<1x624xi1>
    %76 = arith.ori %70, %75 : vector<1x624xi1>
    %c552_i32 = arith.constant 552 : i32
    %77 = vector.broadcast %c552_i32 : i32 to vector<1x624xi32>
    %78 = arith.cmpi sge, %0, %77 : vector<1x624xi32>
    %c560_i32 = arith.constant 560 : i32
    %79 = vector.broadcast %c560_i32 : i32 to vector<1x624xi32>
    %80 = arith.cmpi slt, %0, %79 : vector<1x624xi32>
    %81 = arith.andi %78, %80 : vector<1x624xi1>
    %82 = arith.ori %76, %81 : vector<1x624xi1>
    %c600_i32 = arith.constant 600 : i32
    %83 = vector.broadcast %c600_i32 : i32 to vector<1x624xi32>
    %84 = arith.cmpi sge, %0, %83 : vector<1x624xi32>
    %c608_i32 = arith.constant 608 : i32
    %85 = vector.broadcast %c608_i32 : i32 to vector<1x624xi32>
    %86 = arith.cmpi slt, %0, %85 : vector<1x624xi32>
    %87 = arith.andi %84, %86 : vector<1x624xi1>
    %88 = arith.ori %82, %87 : vector<1x624xi1>
    %89 = arith.andi %88, %4 : vector<1x624xi1>
    %c528_i32 = arith.constant 528 : i32
    %90 = vector.broadcast %c528_i32 : i32 to vector<1x624xi32>
    %91 = arith.cmpi sge, %0, %90 : vector<1x624xi32>
    %c576_i32 = arith.constant 576 : i32
    %92 = vector.broadcast %c576_i32 : i32 to vector<1x624xi32>
    %93 = arith.cmpi slt, %0, %92 : vector<1x624xi32>
    %94 = arith.andi %91, %93 : vector<1x624xi1>
    %c0 = arith.constant 0 : index
    %c0_2 = arith.constant 0 : index
    %95 = vector.load %arg0[%c0, %c0_2] : memref<12x624xf32, #tpu.memory_space<vmem>>, vector<12x624xf32>
    %96 = vector.extract_strided_slice %95 {offsets = [8, 0], sizes = [1, 624], strides = [1, 1]} : vector<12x624xf32> to vector<1x624xf32>
    %cst = arith.constant 1.000000e+00 : f32
    %97 = vector.broadcast %cst : f32 to vector<1x624xf32>
    %98 = arith.addf %96, %97 : vector<1x624xf32>
    %c7_i32 = arith.constant 7 : i32
    %99 = vector.broadcast %c7_i32 : i32 to vector<1x624xi32>
    %100 = arith.andi %0, %99 : vector<1x624xi32>
    %c1_i32_3 = arith.constant 1 : i32
    %101 = vector.broadcast %c1_i32_3 : i32 to vector<1x624xi32>
    %102 = arith.cmpi eq, %100, %101 : vector<1x624xi32>
    %c618_i32 = arith.constant 618 : i32
    %103 = tpu.dynamic_rotate %98 by %c618_i32 dim 1 : vector<1x624xf32>, i32 -> vector<1x624xf32>
    %cst_4 = arith.constant 3.000000e+00 : f32
    %104 = vector.broadcast %cst_4 : f32 to vector<1x624xf32>
    %105 = arith.mulf %103, %104 : vector<1x624xf32>
    %106 = arith.select %102, %105, %98 : vector<1x624xi1>, vector<1x624xf32>
    %c615_i32 = arith.constant 615 : i32
    %107 = tpu.dynamic_rotate %106 by %c615_i32 dim 1 : vector<1x624xf32>, i32 -> vector<1x624xf32>
    %108 = math.exp %107 : vector<1x624xf32>
    %109 = arith.select %89, %108, %106 : vector<1x624xi1>, vector<1x624xf32>
    %110 = arith.mulf %106, %106 : vector<1x624xf32>
    %111 = arith.select %8, %110, %109 : vector<1x624xi1>, vector<1x624xf32>
    %cst_5 = arith.constant 5.000000e-01 : f32
    %112 = vector.broadcast %cst_5 : f32 to vector<1x624xf32>
    %113 = arith.mulf %111, %112 : vector<1x624xf32>
    %114 = arith.select %94, %113, %111 : vector<1x624xi1>, vector<1x624xf32>
    %115 = tpu.iota {dimensions = array<i32: 0>} : vector<12x624xi32>
    %c2_i32 = arith.constant 2 : i32
    %116 = vector.broadcast %c2_i32 : i32 to vector<12x624xi32>
    %117 = arith.cmpi sge, %115, %116 : vector<12x624xi32>
    %c10_i32 = arith.constant 10 : i32
    %118 = vector.broadcast %c10_i32 : i32 to vector<12x624xi32>
    %119 = arith.cmpi slt, %115, %118 : vector<12x624xi32>
    %120 = arith.andi %117, %119 : vector<12x624xi1>
    %cst_6 = arith.constant 1.000000e+00 : f32
    %121 = vector.broadcast %cst_6 : f32 to vector<12x624xf32>
    %122 = arith.addf %95, %121 : vector<12x624xf32>
    %123 = arith.select %120, %122, %95 : vector<12x624xi1>, vector<12x624xf32>
    %cst_7 = arith.constant 0.000000e+00 : f32
    %cst_8 = arith.constant 5.000000e-01 : f32
    %124 = vector.broadcast %cst_7 : f32 to vector<12x624xf32>
    %125 = arith.maximumf %124, %123 : vector<12x624xf32>
    %126 = vector.broadcast %cst_8 : f32 to vector<12x624xf32>
    %127 = arith.minimumf %126, %125 : vector<12x624xf32>
    %128 = vector.shape_cast %89 : vector<1x624xi1> to vector<1x624xi1>
    %129 = vector.broadcast %128 : vector<1x624xi1> to vector<12x624xi1>
    %130 = arith.select %129, %127, %123 : vector<12x624xi1>, vector<12x624xf32>
    %131 = arith.mulf %123, %123 : vector<12x624xf32>
    %132 = vector.shape_cast %8 : vector<1x624xi1> to vector<1x624xi1>
    %133 = vector.broadcast %132 : vector<1x624xi1> to vector<12x624xi1>
    %134 = arith.select %133, %131, %130 : vector<12x624xi1>, vector<12x624xf32>
    %c2_i32_9 = arith.constant 2 : i32
    %135 = vector.broadcast %c2_i32_9 : i32 to vector<12x624xi32>
    %136 = arith.cmpi sge, %115, %135 : vector<12x624xi32>
    %c11_i32 = arith.constant 11 : i32
    %137 = vector.broadcast %c11_i32 : i32 to vector<12x624xi32>
    %138 = arith.cmpi slt, %115, %137 : vector<12x624xi32>
    %139 = arith.andi %136, %138 : vector<12x624xi1>
    %140 = vector.broadcast %94 : vector<1x624xi1> to vector<12x624xi1>
    %141 = arith.andi %139, %140 : vector<12x624xi1>
    %cst_10 = arith.constant 5.000000e-01 : f32
    %142 = vector.broadcast %cst_10 : f32 to vector<12x624xf32>
    %143 = arith.mulf %134, %142 : vector<12x624xf32>
    %144 = arith.select %141, %143, %134 : vector<12x624xi1>, vector<12x624xf32>
    %c8_i32_11 = arith.constant 8 : i32
    %145 = vector.broadcast %c8_i32_11 : i32 to vector<12x624xi32>
    %146 = arith.cmpi eq, %115, %145 : vector<12x624xi32>
    %147 = vector.shape_cast %114 : vector<1x624xf32> to vector<1x624xf32>
    %148 = vector.broadcast %147 : vector<1x624xf32> to vector<12x624xf32>
    %149 = arith.select %146, %148, %144 : vector<12x624xi1>, vector<12x624xf32>
    %c0_12 = arith.constant 0 : index
    %c0_13 = arith.constant 0 : index
    %150 = vector.load %arg4[%c0_12, %c0_13] : memref<12x624xf32, #tpu.memory_space<vmem>>, vector<12x624xf32>
    tpu.vector_store %arg4[%c0_12, %c0_13], %149 {strides = array<i32>} : memref<12x624xf32, #tpu.memory_space<vmem>>, vector<12x624xf32>,
    %c0_14 = arith.constant 0 : index
    %c0_15 = arith.constant 0 : index
    %151 = vector.load %arg1[%c0_14, %c0_15] : memref<6x48xf32, #tpu.memory_space<vmem>>, vector<6x48xf32>
    %152 = tpu.iota {dimensions = array<i32: 1>} : vector<6x48xi32>
    %c26_i32 = arith.constant 26 : i32
    %153 = tpu.dynamic_rotate %151 by %c26_i32 dim 1 : vector<6x48xf32>, i32 -> vector<6x48xf32>
    %c43_i32 = arith.constant 43 : i32
    %154 = vector.broadcast %c43_i32 : i32 to vector<6x48xi32>
    %155 = arith.cmpi sge, %152, %154 : vector<6x48xi32>
    %c47_i32 = arith.constant 47 : i32
    %156 = vector.broadcast %c47_i32 : i32 to vector<6x48xi32>
    %157 = arith.cmpi slt, %152, %156 : vector<6x48xi32>
    %158 = arith.andi %155, %157 : vector<6x48xi1>
    %cst_16 = arith.constant 1.100000e+01 : f32
    %159 = vector.broadcast %cst_16 : f32 to vector<6x48xf32>
    %160 = arith.subf %153, %159 : vector<6x48xf32>
    %161 = arith.select %158, %160, %151 : vector<6x48xi1>, vector<6x48xf32>
    %c0_17 = arith.constant 0 : index
    %c0_18 = arith.constant 0 : index
    %162 = vector.load %arg5[%c0_17, %c0_18] : memref<6x48xf32, #tpu.memory_space<vmem>>, vector<6x48xf32>
    tpu.vector_store %arg5[%c0_17, %c0_18], %161 {strides = array<i32>} : memref<6x48xf32, #tpu.memory_space<vmem>>, vector<6x48xf32>,
    %c0_19 = arith.constant 0 : index
    %c0_20 = arith.constant 0 : index
    %163 = vector.load %arg2[%c0_19, %c0_20] : memref<6x32xf32, #tpu.memory_space<vmem>>, vector<6x32xf32>
    %164 = tpu.iota {dimensions = array<i32: 0>} : vector<6x32xi32>
    %c0_i32_21 = arith.constant 0 : i32
    %165 = vector.broadcast %c0_i32_21 : i32 to vector<6x32xi32>
    %166 = arith.cmpi eq, %164, %165 : vector<6x32xi32>
    %167 = vector.extract_strided_slice %163 {offsets = [5, 0], sizes = [1, 32], strides = [1, 1]} : vector<6x32xf32> to vector<1x32xf32>
    %168 = vector.extract_strided_slice %163 {offsets = [3, 0], sizes = [1, 32], strides = [1, 1]} : vector<6x32xf32> to vector<1x32xf32>
    %169 = arith.mulf %167, %168 : vector<1x32xf32>
    %170 = vector.shape_cast %169 : vector<1x32xf32> to vector<1x32xf32>
    %171 = vector.broadcast %170 : vector<1x32xf32> to vector<6x32xf32>
    %172 = arith.select %166, %171, %163 : vector<6x32xi1>, vector<6x32xf32>
    %c0_22 = arith.constant 0 : index
    %c0_23 = arith.constant 0 : index
    %173 = vector.load %arg6[%c0_22, %c0_23] : memref<6x32xf32, #tpu.memory_space<vmem>>, vector<6x32xf32>
    tpu.vector_store %arg6[%c0_22, %c0_23], %172 {strides = array<i32>} : memref<6x32xf32, #tpu.memory_space<vmem>>, vector<6x32xf32>,
    %c0_24 = arith.constant 0 : index
    %c0_25 = arith.constant 0 : index
    %174 = vector.load %arg3[%c0_24, %c0_25] : memref<120x8xf32, #tpu.memory_space<vmem>>, vector<120x8xf32>
    %c0_26 = arith.constant 0 : index
    %c0_27 = arith.constant 0 : index
    %175 = vector.load %arg7[%c0_26, %c0_27] : memref<120x8xf32, #tpu.memory_space<vmem>>, vector<120x8xf32>
    tpu.vector_store %arg7[%c0_26, %c0_27], %174 {strides = array<i32>} : memref<120x8xf32, #tpu.memory_space<vmem>>, vector<120x8xf32>,
    %c4 = arith.constant 4 : index
    %c0_28 = arith.constant 0 : index
    %176 = vector.load %arg3[%c4, %c0_28] : memref<120x8xf32, #tpu.memory_space<vmem>>, vector<1x8xf32>
    %cst_29 = arith.constant 2.300000e+01 : f32
    %177 = vector.broadcast %cst_29 : f32 to vector<1x8xf32>
    %178 = arith.addf %176, %177 : vector<1x8xf32>
    %c80 = arith.constant 80 : index
    %c0_30 = arith.constant 0 : index
    %179 = vector.load %arg7[%c80, %c0_30] : memref<120x8xf32, #tpu.memory_space<vmem>>, vector<1x8xf32>
    tpu.vector_store %arg7[%c80, %c0_30], %178 {strides = array<i32>} : memref<120x8xf32, #tpu.memory_space<vmem>>, vector<1x8xf32>,
    %c8 = arith.constant 8 : index
    %c0_31 = arith.constant 0 : index
    %180 = vector.load %arg3[%c8, %c0_31] : memref<120x8xf32, #tpu.memory_space<vmem>>, vector<1x8xf32>
    %cst_32 = arith.constant 2.300000e+01 : f32
    %181 = vector.broadcast %cst_32 : f32 to vector<1x8xf32>
    %182 = arith.addf %180, %181 : vector<1x8xf32>
    %c82 = arith.constant 82 : index
    %c0_33 = arith.constant 0 : index
    %183 = vector.load %arg7[%c82, %c0_33] : memref<120x8xf32, #tpu.memory_space<vmem>>, vector<1x8xf32>
    tpu.vector_store %arg7[%c82, %c0_33], %182 {strides = array<i32>} : memref<120x8xf32, #tpu.memory_space<vmem>>, vector<1x8xf32>,
    %c12 = arith.constant 12 : index
    %c0_34 = arith.constant 0 : index
    %184 = vector.load %arg3[%c12, %c0_34] : memref<120x8xf32, #tpu.memory_space<vmem>>, vector<1x8xf32>
    %cst_35 = arith.constant 2.300000e+01 : f32
    %185 = vector.broadcast %cst_35 : f32 to vector<1x8xf32>
    %186 = arith.addf %184, %185 : vector<1x8xf32>
    %c84 = arith.constant 84 : index
    %c0_36 = arith.constant 0 : index
    %187 = vector.load %arg7[%c84, %c0_36] : memref<120x8xf32, #tpu.memory_space<vmem>>, vector<1x8xf32>
    tpu.vector_store %arg7[%c84, %c0_36], %186 {strides = array<i32>} : memref<120x8xf32, #tpu.memory_space<vmem>>, vector<1x8xf32>,
    %c16 = arith.constant 16 : index
    %c0_37 = arith.constant 0 : index
    %188 = vector.load %arg3[%c16, %c0_37] : memref<120x8xf32, #tpu.memory_space<vmem>>, vector<1x8xf32>
    %cst_38 = arith.constant 2.300000e+01 : f32
    %189 = vector.broadcast %cst_38 : f32 to vector<1x8xf32>
    %190 = arith.addf %188, %189 : vector<1x8xf32>
    %c86 = arith.constant 86 : index
    %c0_39 = arith.constant 0 : index
    %191 = vector.load %arg7[%c86, %c0_39] : memref<120x8xf32, #tpu.memory_space<vmem>>, vector<1x8xf32>
    tpu.vector_store %arg7[%c86, %c0_39], %190 {strides = array<i32>} : memref<120x8xf32, #tpu.memory_space<vmem>>, vector<1x8xf32>,
    %c20 = arith.constant 20 : index
    %c0_40 = arith.constant 0 : index
    %192 = vector.load %arg3[%c20, %c0_40] : memref<120x8xf32, #tpu.memory_space<vmem>>, vector<1x8xf32>
    %cst_41 = arith.constant 2.300000e+01 : f32
    %193 = vector.broadcast %cst_41 : f32 to vector<1x8xf32>
    %194 = arith.addf %192, %193 : vector<1x8xf32>
    %c88 = arith.constant 88 : index
    %c0_42 = arith.constant 0 : index
    %195 = vector.load %arg7[%c88, %c0_42] : memref<120x8xf32, #tpu.memory_space<vmem>>, vector<1x8xf32>
    tpu.vector_store %arg7[%c88, %c0_42], %194 {strides = array<i32>} : memref<120x8xf32, #tpu.memory_space<vmem>>, vector<1x8xf32>,
    %c24 = arith.constant 24 : index
    %c0_43 = arith.constant 0 : index
    %196 = vector.load %arg3[%c24, %c0_43] : memref<120x8xf32, #tpu.memory_space<vmem>>, vector<1x8xf32>
    %cst_44 = arith.constant 2.300000e+01 : f32
    %197 = vector.broadcast %cst_44 : f32 to vector<1x8xf32>
    %198 = arith.addf %196, %197 : vector<1x8xf32>
    %c90 = arith.constant 90 : index
    %c0_45 = arith.constant 0 : index
    %199 = vector.load %arg7[%c90, %c0_45] : memref<120x8xf32, #tpu.memory_space<vmem>>, vector<1x8xf32>
    tpu.vector_store %arg7[%c90, %c0_45], %198 {strides = array<i32>} : memref<120x8xf32, #tpu.memory_space<vmem>>, vector<1x8xf32>,
    %c28 = arith.constant 28 : index
    %c0_46 = arith.constant 0 : index
    %200 = vector.load %arg3[%c28, %c0_46] : memref<120x8xf32, #tpu.memory_space<vmem>>, vector<1x8xf32>
    %cst_47 = arith.constant 2.300000e+01 : f32
    %201 = vector.broadcast %cst_47 : f32 to vector<1x8xf32>
    %202 = arith.addf %200, %201 : vector<1x8xf32>
    %c92 = arith.constant 92 : index
    %c0_48 = arith.constant 0 : index
    %203 = vector.load %arg7[%c92, %c0_48] : memref<120x8xf32, #tpu.memory_space<vmem>>, vector<1x8xf32>
    tpu.vector_store %arg7[%c92, %c0_48], %202 {strides = array<i32>} : memref<120x8xf32, #tpu.memory_space<vmem>>, vector<1x8xf32>,
    %c32 = arith.constant 32 : index
    %c0_49 = arith.constant 0 : index
    %204 = vector.load %arg3[%c32, %c0_49] : memref<120x8xf32, #tpu.memory_space<vmem>>, vector<1x8xf32>
    %cst_50 = arith.constant 2.300000e+01 : f32
    %205 = vector.broadcast %cst_50 : f32 to vector<1x8xf32>
    %206 = arith.addf %204, %205 : vector<1x8xf32>
    %c94 = arith.constant 94 : index
    %c0_51 = arith.constant 0 : index
    %207 = vector.load %arg7[%c94, %c0_51] : memref<120x8xf32, #tpu.memory_space<vmem>>, vector<1x8xf32>
    tpu.vector_store %arg7[%c94, %c0_51], %206 {strides = array<i32>} : memref<120x8xf32, #tpu.memory_space<vmem>>, vector<1x8xf32>,
    %c36 = arith.constant 36 : index
    %c0_52 = arith.constant 0 : index
    %208 = vector.load %arg3[%c36, %c0_52] : memref<120x8xf32, #tpu.memory_space<vmem>>, vector<1x8xf32>
    %cst_53 = arith.constant 2.300000e+01 : f32
    %209 = vector.broadcast %cst_53 : f32 to vector<1x8xf32>
    %210 = arith.addf %208, %209 : vector<1x8xf32>
    %c96 = arith.constant 96 : index
    %c0_54 = arith.constant 0 : index
    %211 = vector.load %arg7[%c96, %c0_54] : memref<120x8xf32, #tpu.memory_space<vmem>>, vector<1x8xf32>
    tpu.vector_store %arg7[%c96, %c0_54], %210 {strides = array<i32>} : memref<120x8xf32, #tpu.memory_space<vmem>>, vector<1x8xf32>,
    %c40 = arith.constant 40 : index
    %c0_55 = arith.constant 0 : index
    %212 = vector.load %arg3[%c40, %c0_55] : memref<120x8xf32, #tpu.memory_space<vmem>>, vector<1x8xf32>
    %cst_56 = arith.constant 2.300000e+01 : f32
    %213 = vector.broadcast %cst_56 : f32 to vector<1x8xf32>
    %214 = arith.addf %212, %213 : vector<1x8xf32>
    %c98 = arith.constant 98 : index
    %c0_57 = arith.constant 0 : index
    %215 = vector.load %arg7[%c98, %c0_57] : memref<120x8xf32, #tpu.memory_space<vmem>>, vector<1x8xf32>
    tpu.vector_store %arg7[%c98, %c0_57], %214 {strides = array<i32>} : memref<120x8xf32, #tpu.memory_space<vmem>>, vector<1x8xf32>,
    %c44 = arith.constant 44 : index
    %c0_58 = arith.constant 0 : index
    %216 = vector.load %arg3[%c44, %c0_58] : memref<120x8xf32, #tpu.memory_space<vmem>>, vector<1x8xf32>
    %cst_59 = arith.constant 2.300000e+01 : f32
    %217 = vector.broadcast %cst_59 : f32 to vector<1x8xf32>
    %218 = arith.addf %216, %217 : vector<1x8xf32>
    %c100 = arith.constant 100 : index
    %c0_60 = arith.constant 0 : index
    %219 = vector.load %arg7[%c100, %c0_60] : memref<120x8xf32, #tpu.memory_space<vmem>>, vector<1x8xf32>
    tpu.vector_store %arg7[%c100, %c0_60], %218 {strides = array<i32>} : memref<120x8xf32, #tpu.memory_space<vmem>>, vector<1x8xf32>,
    %c48 = arith.constant 48 : index
    %c0_61 = arith.constant 0 : index
    %220 = vector.load %arg3[%c48, %c0_61] : memref<120x8xf32, #tpu.memory_space<vmem>>, vector<1x8xf32>
    %cst_62 = arith.constant 2.300000e+01 : f32
    %221 = vector.broadcast %cst_62 : f32 to vector<1x8xf32>
    %222 = arith.addf %220, %221 : vector<1x8xf32>
    %c102 = arith.constant 102 : index
    %c0_63 = arith.constant 0 : index
    %223 = vector.load %arg7[%c102, %c0_63] : memref<120x8xf32, #tpu.memory_space<vmem>>, vector<1x8xf32>
    tpu.vector_store %arg7[%c102, %c0_63], %222 {strides = array<i32>} : memref<120x8xf32, #tpu.memory_space<vmem>>, vector<1x8xf32>,
    %c52 = arith.constant 52 : index
    %c0_64 = arith.constant 0 : index
    %224 = vector.load %arg3[%c52, %c0_64] : memref<120x8xf32, #tpu.memory_space<vmem>>, vector<1x8xf32>
    %cst_65 = arith.constant 2.300000e+01 : f32
    %225 = vector.broadcast %cst_65 : f32 to vector<1x8xf32>
    %226 = arith.addf %224, %225 : vector<1x8xf32>
    %c104 = arith.constant 104 : index
    %c0_66 = arith.constant 0 : index
    %227 = vector.load %arg7[%c104, %c0_66] : memref<120x8xf32, #tpu.memory_space<vmem>>, vector<1x8xf32>
    tpu.vector_store %arg7[%c104, %c0_66], %226 {strides = array<i32>} : memref<120x8xf32, #tpu.memory_space<vmem>>, vector<1x8xf32>,
    %c56 = arith.constant 56 : index
    %c0_67 = arith.constant 0 : index
    %228 = vector.load %arg3[%c56, %c0_67] : memref<120x8xf32, #tpu.memory_space<vmem>>, vector<1x8xf32>
    %cst_68 = arith.constant 2.300000e+01 : f32
    %229 = vector.broadcast %cst_68 : f32 to vector<1x8xf32>
    %230 = arith.addf %228, %229 : vector<1x8xf32>
    %c106 = arith.constant 106 : index
    %c0_69 = arith.constant 0 : index
    %231 = vector.load %arg7[%c106, %c0_69] : memref<120x8xf32, #tpu.memory_space<vmem>>, vector<1x8xf32>
    tpu.vector_store %arg7[%c106, %c0_69], %230 {strides = array<i32>} : memref<120x8xf32, #tpu.memory_space<vmem>>, vector<1x8xf32>,
    %c60 = arith.constant 60 : index
    %c0_70 = arith.constant 0 : index
    %232 = vector.load %arg3[%c60, %c0_70] : memref<120x8xf32, #tpu.memory_space<vmem>>, vector<1x8xf32>
    %cst_71 = arith.constant 2.300000e+01 : f32
    %233 = vector.broadcast %cst_71 : f32 to vector<1x8xf32>
    %234 = arith.addf %232, %233 : vector<1x8xf32>
    %c108 = arith.constant 108 : index
    %c0_72 = arith.constant 0 : index
    %235 = vector.load %arg7[%c108, %c0_72] : memref<120x8xf32, #tpu.memory_space<vmem>>, vector<1x8xf32>
    tpu.vector_store %arg7[%c108, %c0_72], %234 {strides = array<i32>} : memref<120x8xf32, #tpu.memory_space<vmem>>, vector<1x8xf32>,
    %c64 = arith.constant 64 : index
    %c0_73 = arith.constant 0 : index
    %236 = vector.load %arg3[%c64, %c0_73] : memref<120x8xf32, #tpu.memory_space<vmem>>, vector<1x8xf32>
    %cst_74 = arith.constant 2.300000e+01 : f32
    %237 = vector.broadcast %cst_74 : f32 to vector<1x8xf32>
    %238 = arith.addf %236, %237 : vector<1x8xf32>
    %c110 = arith.constant 110 : index
    %c0_75 = arith.constant 0 : index
    %239 = vector.load %arg7[%c110, %c0_75] : memref<120x8xf32, #tpu.memory_space<vmem>>, vector<1x8xf32>
    tpu.vector_store %arg7[%c110, %c0_75], %238 {strides = array<i32>} : memref<120x8xf32, #tpu.memory_space<vmem>>, vector<1x8xf32>,
    %c68 = arith.constant 68 : index
    %c0_76 = arith.constant 0 : index
    %240 = vector.load %arg3[%c68, %c0_76] : memref<120x8xf32, #tpu.memory_space<vmem>>, vector<1x8xf32>
    %cst_77 = arith.constant 2.300000e+01 : f32
    %241 = vector.broadcast %cst_77 : f32 to vector<1x8xf32>
    %242 = arith.addf %240, %241 : vector<1x8xf32>
    %c112 = arith.constant 112 : index
    %c0_78 = arith.constant 0 : index
    %243 = vector.load %arg7[%c112, %c0_78] : memref<120x8xf32, #tpu.memory_space<vmem>>, vector<1x8xf32>
    tpu.vector_store %arg7[%c112, %c0_78], %242 {strides = array<i32>} : memref<120x8xf32, #tpu.memory_space<vmem>>, vector<1x8xf32>,
    %c72 = arith.constant 72 : index
    %c0_79 = arith.constant 0 : index
    %244 = vector.load %arg3[%c72, %c0_79] : memref<120x8xf32, #tpu.memory_space<vmem>>, vector<1x8xf32>
    %cst_80 = arith.constant 2.300000e+01 : f32
    %245 = vector.broadcast %cst_80 : f32 to vector<1x8xf32>
    %246 = arith.addf %244, %245 : vector<1x8xf32>
    %c114 = arith.constant 114 : index
    %c0_81 = arith.constant 0 : index
    %247 = vector.load %arg7[%c114, %c0_81] : memref<120x8xf32, #tpu.memory_space<vmem>>, vector<1x8xf32>
    tpu.vector_store %arg7[%c114, %c0_81], %246 {strides = array<i32>} : memref<120x8xf32, #tpu.memory_space<vmem>>, vector<1x8xf32>,
    %c76 = arith.constant 76 : index
    %c0_82 = arith.constant 0 : index
    %248 = vector.load %arg3[%c76, %c0_82] : memref<120x8xf32, #tpu.memory_space<vmem>>, vector<1x8xf32>
    %cst_83 = arith.constant 2.300000e+01 : f32
    %249 = vector.broadcast %cst_83 : f32 to vector<1x8xf32>
    %250 = arith.addf %248, %249 : vector<1x8xf32>
    %c116 = arith.constant 116 : index
    %c0_84 = arith.constant 0 : index
    %251 = vector.load %arg7[%c116, %c0_84] : memref<120x8xf32, #tpu.memory_space<vmem>>, vector<1x8xf32>
    tpu.vector_store %arg7[%c116, %c0_84], %250 {strides = array<i32>} : memref<120x8xf32, #tpu.memory_space<vmem>>, vector<1x8xf32>,
    %c80_85 = arith.constant 80 : index
    %c0_86 = arith.constant 0 : index
    %252 = vector.load %arg3[%c80_85, %c0_86] : memref<120x8xf32, #tpu.memory_space<vmem>>, vector<1x8xf32>
    %cst_87 = arith.constant 2.300000e+01 : f32
    %253 = vector.broadcast %cst_87 : f32 to vector<1x8xf32>
    %254 = arith.addf %252, %253 : vector<1x8xf32>
    %c118 = arith.constant 118 : index
    %c0_88 = arith.constant 0 : index
    %255 = vector.load %arg7[%c118, %c0_88] : memref<120x8xf32, #tpu.memory_space<vmem>>, vector<1x8xf32>
    tpu.vector_store %arg7[%c118, %c0_88], %254 {strides = array<i32>} : memref<120x8xf32, #tpu.memory_space<vmem>>, vector<1x8xf32>,
    return
  }
}

</mosaic_0001>

<bundles_post_ra>
// kernel: model_forward.1
= control target key start
LH: loop header
LB: loop body
LE: loop exit
PB: predicated region body
PF: predicated region fallthrough
CT: control target
= control target key end

     0   :  { %v21_v0 = vlaneseq  ;;  %s798_s30 = smov 112   ;;  %vm671_vm1 = vcmask 259072   ;;  %s800_s12 = smov 48   ;;  %vm357_vm2 = vcmask 1048448   ;;  %vm381_vm3 = vcmask 998400   ;;  %s1698_s0 = inlined_call_operand.vmem [shape: f32[12,624], index: 0, kind: input, shape index: {}]   ;;  %s1699_s2 = inlined_call_operand.vmem [shape: f32[6,32], index: 2, kind: input, shape index: {}]   ;;  %s1700_s1 = inlined_call_operand.vmem [shape: f32[6,48], index: 1, kind: input, shape index: {}]   ;;  %s1701_s6 = inlined_call_operand.vmem [shape: f32[6,32], index: 6, kind: output, shape index: {2}]   ;;  %s1702_s4 = inlined_call_operand.vmem [shape: f32[12,624], index: 4, kind: output, shape index: {0}]   ;;  %s1703_s3 = inlined_call_operand.vmem [shape: f32[120,8], index: 3, kind: input, shape index: {}]   ;;  %s1704_s7 = inlined_call_operand.vmem [shape: f32[120,8], index: 7, kind: output, shape index: {3}]   ;;  %s1705_s5 = inlined_call_operand.vmem [shape: f32[6,48], index: 5, kind: output, shape index: {1}]  }
   0x1   :  { %v847_v1 = vld [vmem:[%s1698_s0 + $0x28] sm:$0xf]  ;;  %v660_v2 = vld [vmem:[%s1699_s2] sm:$0x3f]  ;;  %v855_v3 = vld [vmem:[%s1698_s0 + $0x30] sm:$0xf] }
   0x2   :  { %v858_v4 = vadd.f32 1.0, %v847_v1  ;;  %v860_v5 = vshrl.u32 %v21_v0, 7  ;;  %v663_v6 = vrot.slane %v660_v2, 6  ;;  %v863_v7 = vadd.f32 1.0, %v855_v3  ;;  %s799_s2 = smov 122   ;;  %s801_s17 = smov 119  }
   0x3   :  { %v876_v14 = vld [vmem:[%s1700_s1] sm:$0x3f]  ;;  %v886_v15 = vld [vmem:[%s1698_s0 + $0x48] sm:$0xf]  ;;  %v888_v16 = vand.u32 127, %v21_v0  ;;  %vm642_vm5 = vcmask 1047936  }
   0x4   :  { %v665_v8 = vmul.f32 %v663_v6, %v660_v2  ;;  %v668_v9 = vsub.s32 5, %v860_v5  ;;  %358 = vrot.lane.b32.xlu0 %v858_v4, %s798_s30  ;;  %vm661_vm0 = vcmp.eq.s32.totalorder %v860_v5, 0  ;;  %v362_v10 = vmul.f32 3.0, %v863_v7  ;;  %1741 = vst [vmem:[#allocation2_spill] sm:$0xff] %v876_v14  ;;  %v896_v18 = vld [vmem:[%s1698_s0 + $0x38] sm:$0xf] }
   0x5   :  { %v361_v11 = vmul.f32 3.0, %v858_v4  ;;  %v891_v17 = vadd.f32 1.0, %v886_v15  ;;  %v347_v19 = vand.u32 7, %v888_v16  ;;  %v900_v21 = vadd.f32 1.0, %v896_v18  ;;  %v905_v22 = vld [vmem:[%s1698_s0 + $0x40] sm:$0xf] }
   0x6   :  { %v669_v12 = vrot.slane %v665_v8, %v668_v9  ;;  %373 = vrot.lane.b32.xlu1 %v362_v10, %s799_s2  ;;  %v910_v26 = vadd.f32 1.0, %v905_v22  ;;  %v929_v36 = vadd.s32 512, %v888_v16  ;;  %v932_v37 = vadd.s32 128, %v888_v16  ;;  %v332_v61 = vld [vmem:[%s1698_s0] sm:$0xff]  ;;  %s803_s10 = smov 106  }
   0x7   :  { %vm352_vm4 = vcmp.eq.s32.totalorder %v347_v19, 1  ;;  %v363_v28 = vmul.f32 3.0, %v900_v21  ;;  %vm52_vm6 = vcmp.ge.s32.totalorder %v888_v16, 24  ;;  %vm57_vm7 = vcmp.lt.s32.totalorder %v888_v16, 32 }
   0x8   :  { %v670_v13 = vsel %vm661_vm0, %v669_v12, %v660_v2  ;;  %371 = vrot.lane.b32.xlu0 %v361_v11, %s799_s2  ;;  %v364_v32 = vmul.f32 3.0, %v910_v26  ;;  %v351_v38 = vand.u32 7, %v929_v36  ;;  %vm72_vm8 = vcmp.ge.s32.totalorder %v888_v16, 72  ;;  %vm942_vm10 = vmand %vm52_vm6, %vm57_vm7  ;;  %v333_v12 = vld [vmem:[%s1698_s0 + $0x8] sm:$0xff] }
   0x9   :  { %672 = vst.msk [vmem:[%s1701_s6] sm:$0x3f] %vm671_vm1, %v670_v13  ;;  %vm77_vm9 = vcmp.lt.s32.totalorder %v888_v16, 80  ;;  %v940_v39 = vadd.s32 256, %v888_v16  ;;  %v348_v41 = vand.u32 7, %v932_v37  ;;  %v948_v42 = vadd.s32 384, %v888_v16 }
   0xa   :  { %643 = vrot.lane.b32.xlu1 %v876_v14, %s800_s12  ;;  %vm950_vm11 = vmand %vm72_vm8, %vm77_vm9  ;;  %vm356_vm12 = vcmp.eq.s32.totalorder %v351_v38, 1  ;;  %v27_v45 = vand.u32 1, %v888_v16  ;;  %vm92_vm14 = vcmp.ge.s32.totalorder %v888_v16, 120  ;;  %v1747_v53 = vmov 0 }
   0xb   :  { %v349_v46 = vand.u32 7, %v940_v39  ;;  %vm87_vm13 = vmor %vm942_vm10, %vm950_vm11  ;;  %vm353_vm15 = vcmp.eq.s32.totalorder %v348_v41, 1  ;;  %v350_v49 = vand.u32 7, %v948_v42  ;;  %v990_v62 = vadd.s32 8, %v860_v5 }
   0xc   :  { %vm968_vm0 = vcmp.eq.s32.totalorder %v27_v45, 0  ;;  %vm972_vm1 = vmor %vm87_vm13, %vm92_vm14  ;;  %v28_v0 = vand.u32 1, %v932_v37  ;;  %v37_v8 = vand.u32 8, %v888_v16  ;;  %vm1709_vm7 = vcmp.ge.s32.totalorder %v860_v5, 2  ;;  %v676_v45 = vld [vmem:[%s1703_s3 + $0x18] sm:$0xff] }
   0xd   :  { %v1748_v53 = vsel %vm968_vm0, 4294967295, %v1747_v53  ;;  %vm355_vm6 = vcmp.eq.s32.totalorder %v350_v49, 1  ;;  %v1716_v9 = vmov 0   ;;  %v468_v11 = vadd.f32 1.0, %v332_v61 }
   0xe   :  { %vm118_vm8 = vcmp.lt.s32.totalorder %v932_v37, 176  ;;  %vm133_vm9 = vcmp.ge.s32.totalorder %v932_v37, 216  ;;  %vm138_vm10 = vcmp.lt.s32.totalorder %v932_v37, 224  ;;  %vm1020_vm11 = vcmp.eq.s32.totalorder %v28_v0, 0 }
   0xf   :  { %v473_v19 = vsel %vm1709_vm7, %v468_v11, %v332_v61  ;;  %vm143_vm13 = vmand %vm133_vm9, %vm138_vm10  ;;  %v1762_v41 = vmov 0  ;;  %v1767_v49 = vmov 0 }
  0x76   :  { %v359_v20 = vpop.permute.xlu0 %358 }
  0x77   :  { %v360_v23 = vsel %vm357_vm2, %v359_v20, %v891_v17  ;;  %v729_v20 = vld [vmem:[%s1703_s3 + $0x24] sm:$0x1] }
  0x78   :  { %v365_v24 = vmul.f32 3.0, %v360_v23  ;;  %v374_v25 = vpop.permute.xlu1 %373 }
  0x7a   :  { %379 = vrot.lane.b32.xlu0 %v365_v24, %s799_s2  ;;  %v372_v27 = vpop.permute.xlu0 %371  ;;  %v469_v24 = vadd.f32 1.0, %v333_v12 }
  0x7b   :  { %v382_v29 = vsel %vm381_vm3, %v372_v27, %v374_v25  ;;  %v523_v27 = vmul.f32 %v473_v19, %v473_v19 }
  0x7c   :  { %v916_v30 = vsel %vm352_vm4, %v382_v29, %v858_v4  ;;  %v644_v33 = vpop.permute.xlu1 %643  ;;  %vm354_vm4 = vcmp.eq.s32.totalorder %v349_v46, 1  ;;  %v31_v29 = vand.u32 1, %v929_v36 }
  0x7d   :  { %396 = vrot.lane.b32.xlu1 %v916_v30, %s798_s30  ;;  %v399_v31 = vmul.f32 1.442695, %v916_v30  ;;  %v645_v34 = vsel %vm642_vm5, %v644_v33, %v876_v14  ;;  %v1758_v33 = vmov 0 }
  0x7e   :  { %375 = vrot.lane.b32.xlu0 %v363_v28, %s799_s2  ;;  %v38_v28 = vand.u32 8, %v932_v37 }
  0x7f   :  { %788 = vpow2.f32 %v399_v31  ;;  %v474_v31 = vsel %vm1709_vm7, %v469_v24, %v333_v12  ;;  %v39_v24 = vand.u32 8, %v940_v39  ;;  %v1833_v12 = vld [vmem:[#allocation2_spill] sm:$0xff] }
  0x81   :  { %377 = vrot.lane.b32.xlu1 %v364_v32, %s799_s2 }
  0x82   :  { %646 = vrot.lane.b32.xlu0 %v645_v34, %s800_s12  ;;  %v484_v34 = vmax.f32 %v474_v31, 0.0 }
  0x89   :  { %v789_v35 = vpop.eup %788 }
  0x8a   :  { %414 = vrot.lane.b32.xlu0 %v789_v35, %s801_s17  ;;  %v524_v35 = vmul.f32 %v474_v31, %v474_v31 }
  0xec   :  { %v380_v44 = vpop.permute.xlu0 %379 }
  0xed   :  { %v962_v47 = vsel %vm356_vm12, %v380_v44, %v891_v17 }
  0xee   :  { %1746 = vst [vmem:[#allocation3_spill] sm:$0xff] %v962_v47 }
  0xef   :  { %v397_v48 = vpop.permute.xlu1 %396 }
  0xf0   :  { %v398_v50 = vsel %vm357_vm2, %v397_v48, %v962_v47  ;;  %v376_v51 = vpop.permute.xlu0 %375  ;;  %vm1706_vm2 = vmand %vm972_vm1, %vm968_vm0  ;;  %vm688_vm0 = vcmask 64512  }
  0xf1   :  { %v383_v52 = vsel %vm381_vm3, %v374_v25, %v376_v51  ;;  %v407_v56 = vmul.f32 1.442695, %v398_v50  ;;  %v1009_v10 = vsel %vm1706_vm2, 1, %v1716_v9  ;;  %v483_v25 = vmax.f32 %v473_v19, 0.0  ;;  %v681_v50 = vld [vmem:[%s1703_s3 + $0x40] sm:$0xff]  ;;  %692 = vst.msk [vmem:[%s1704_s7 + $0x18] sm:$0xff] %vm688_vm0, %v676_v45 }
  0xf2   :  { %v977_v55 = vsel %vm353_vm15, %v383_v52, %v863_v7  ;;  %vm276_vm15 = vcmp.ge.s32.totalorder %v929_v36, 552  ;;  %vm1707_vm9 = vcmp.eq.s32.totalorder %v1009_v10, 1  ;;  %v41_v52 = vand.u32 8, %v929_v36  ;;  %697 = vst.msk [vmem:[%s1704_s7 + $0x40] sm:$0xff] %vm688_vm0, %v681_v50 }
  0xf3   :  { %1751 = vst [vmem:[#allocation4_spill] sm:$0xff] %v977_v55  ;;  %v401_v57 = vmul.f32 1.442695, %v977_v55  ;;  %v378_v58 = vpop.permute.xlu1 %377  ;;  %v493_v32 = vmin.f32 %v483_v25, 0.5  ;;  %vm154_vm2 = vcmp.ge.s32.totalorder %v940_v39, 264  ;;  %v334_v25 = vld [vmem:[%s1698_s0 + $0x10] sm:$0xff] }
  0xf4   :  { %v384_v59 = vsel %vm381_vm3, %v376_v51, %v378_v58  ;;  %v385_v60 = vsel %vm381_vm3, %v378_v58, %v380_v44  ;;  %vm113_vm3 = vcmp.ge.s32.totalorder %v932_v37, 168  ;;  %v647_v40 = vpop.permute.xlu0 %646  ;;  %v494_v44 = vmin.f32 %v484_v34, 0.5  ;;  %v723_v55 = vld [vmem:[%s1703_s3 + $0x1c] sm:$0x1] }
  0xf5   :  { %790 = vpow2.f32 %v401_v57  ;;  %v993_v63 = vsel %vm354_vm4, %v384_v59, %v900_v21  ;;  %v997_v2 = vsel %vm355_vm6, %v385_v60, %v910_v26  ;;  %vm1024_vm12 = vmand %vm113_vm3, %vm118_vm8  ;;  %vm281_vm4 = vcmp.lt.s32.totalorder %v929_v36, 560 }
  0xf6   :  { %1752 = vst [vmem:[#allocation5_spill] sm:$0xff] %v993_v63  ;;  %1753 = vst [vmem:[#allocation6_spill] sm:$0xff] %v997_v2  ;;  %v403_v6 = vmul.f32 1.442695, %v993_v63  ;;  %792 = vpow2.f32 %v407_v56  ;;  %v405_v13 = vmul.f32 1.442695, %v997_v2  ;;  %v513_v43 = vsel %vm1707_vm9, %v493_v32, %v473_v19 }
  0xf7   :  { %vm148_vm14 = vmor %vm1024_vm12, %vm143_vm13  ;;  %vm296_vm6 = vcmp.ge.s32.totalorder %v929_v36, 600  ;;  %vm1708_vm3 = vcmp.lt.s32.totalorder %v990_v62, 10  ;;  %vm301_vm12 = vcmp.lt.s32.totalorder %v929_v36, 608  ;;  %v648_v46 = vsel %vm642_vm5, %v647_v40, %v876_v14  ;;  %v704_v32 = vld [vmem:[%s1703_s3 + $0x4] sm:$0x1] }
  0xf8   :  { %794 = vpow2.f32 %v403_v6  ;;  %vm1040_vm8 = vmand %vm148_vm14, %vm1020_vm11  ;;  %v1054_v38 = vsel %vm1708_vm3, %v900_v21, %v896_v18  ;;  %vm1056_vm11 = vcmp.eq.s32.totalorder %v37_v8, 0  ;;  %v336_v18 = vld [vmem:[%s1698_s0 + $0x20] sm:$0xff]  ;;  %vm1075_vm14 = vcmp.eq.s32.totalorder %v38_v28, 0  ;;  %v714_v19 = vld [vmem:[%s1703_s3 + $0x10] sm:$0x1] }
  0xf9   :  { %v1759_v33 = vsel %vm1040_vm8, 4294967295, %v1758_v33  ;;  %796 = vpow2.f32 %v405_v13  ;;  %vm1045_vm10 = vmand %vm276_vm15, %vm281_vm4  ;;  %v1763_v41 = vsel %vm1056_vm11, 4294967295, %v1762_v41  ;;  %v543_v48 = vsel %vm1056_vm11, %v523_v27, %v513_v43  ;;  %v335_v27 = vld [vmem:[%s1698_s0 + $0x18] sm:$0xff]  ;;  %v673_v40 = vld [vmem:[%s1703_s3] sm:$0xff] }
  0xfa   :  { %1764 = vst [vmem:[#allocation7_spill] sm:$0xff] %v1763_v41  ;;  %vm1064_vm13 = vmand %vm296_vm6, %vm301_vm12  ;;  %v1768_v49 = vsel %vm1075_vm14, 4294967295, %v1767_v49  ;;  %vm1079_vm15 = vcmp.eq.s32.totalorder %v31_v29, 0  ;;  %v514_v51 = vsel %vm1040_vm8, %v494_v44, %v474_v31  ;;  %vm321_vm5 = vcmp.ge.s32.totalorder %v929_v36, 528  ;;  %v674_v43 = vld [vmem:[%s1703_s3 + $0x8] sm:$0xff]  ;;  %v675_v44 = vld [vmem:[%s1703_s3 + $0x10] sm:$0xff] }
  0xfb   :  { %1769 = vst [vmem:[#allocation8_spill] sm:$0xff] %v1768_v49  ;;  %vm311_vm4 = vmor %vm1045_vm10, %vm1064_vm13  ;;  %vm326_vm6 = vcmp.lt.s32.totalorder %v929_v36, 576  ;;  %v1100_v57 = vsel %vm1708_vm3, %v910_v26, %v905_v22  ;;  %v544_v58 = vsel %vm1075_vm14, %v524_v35, %v514_v51  ;;  %v472_v59 = vadd.f32 1.0, %v336_v18  ;;  %v682_v51 = vld [vmem:[%s1703_s3 + $0x48] sm:$0xff]  ;;  %v717_v2 = vld [vmem:[%s1703_s3 + $0x14] sm:$0x1] }
  0xfc   :  { %629 = vst [vmem:[%s1702_s4] sm:$0xff] %v543_v48  ;;  %v490_v61 = vmax.f32 %v1054_v38, 0.0  ;;  %v781_v0 = vadd.f32 -11.0, %v648_v46  ;;  %630 = vst [vmem:[%s1702_s4 + $0x8] sm:$0xff] %v544_v58  ;;  %v1774_v26 = vmov 0  ;;  %v29_v6 = vand.u32 1, %v940_v39  ;;  %v679_v46 = vld [vmem:[%s1703_s3 + $0x30] sm:$0xff] }
  0xfd   :  { %vm1115_vm12 = vmand %vm311_vm4, %vm1079_vm15  ;;  %v477_v36 = vsel %vm1709_vm7, %v472_v59, %v336_v18  ;;  %v30_v8 = vand.u32 1, %v948_v42  ;;  %vm159_vm10 = vcmp.lt.s32.totalorder %v940_v39, 272  ;;  %v491_v11 = vmax.f32 %v1100_v57, 0.0  ;;  %v677_v18 = vld [vmem:[%s1703_s3 + $0x20] sm:$0xff]  ;;  %v680_v48 = vld [vmem:[%s1703_s3 + $0x38] sm:$0xff]  ;;  %689 = vst.msk [vmem:[%s1704_s7] sm:$0xff] %vm688_vm0, %v673_v40 }
  0xfe   :  { %vm1121_vm9 = vmand %vm321_vm5, %vm326_vm6  ;;  %vm1132_vm13 = vcmp.eq.s32.totalorder %v41_v52, 0  ;;  %v487_v13 = vmax.f32 %v477_v36, 0.0  ;;  %v527_v23 = vmul.f32 %v477_v36, %v477_v36  ;;  %vm174_vm6 = vcmp.ge.s32.totalorder %v940_v39, 312  ;;  %v683_v52 = vld [vmem:[%s1703_s3 + $0x50] sm:$0xff]  ;;  %v685_v58 = vld [vmem:[%s1703_s3 + $0x60] sm:$0xff]  ;;  %690 = vst.msk [vmem:[%s1704_s7 + $0x8] sm:$0xff] %vm688_vm0, %v674_v43 }
  0xff   :  { %v791_v21 = vpop.eup %790  ;;  %v1775_v26 = vsel %vm1121_vm9, 4294967295, %v1774_v26  ;;  %vm1136_vm4 = vmand %vm154_vm2, %vm159_vm10  ;;  %vm179_vm3 = vcmp.lt.s32.totalorder %v940_v39, 320  ;;  %v40_v29 = vand.u32 8, %v948_v42  ;;  %vm199_vm15 = vcmp.lt.s32.totalorder %v940_v39, 368  ;;  %v726_v41 = vld [vmem:[%s1703_s3 + $0x20] sm:$0x1] }
 0x100   :  { %416 = vrot.lane.b32.xlu1 %v791_v21, %s801_s17  ;;  %v793_v56 = vpop.eup %792  ;;  %1776 = vst [vmem:[#allocation9_spill] sm:$0xff] %v1775_v26  ;;  %vm1144_vm5 = vmand %vm1709_vm7, %vm1121_vm9  ;;  %v497_v28 = vmin.f32 %v487_v13, 0.5  ;;  %vm1167_vm7 = vcmp.eq.s32.totalorder %v29_v6, 0  ;;  %vm1171_vm14 = vcmp.eq.s32.totalorder %v30_v8, 0  ;;  %v678_v21 = vld [vmem:[%s1703_s3 + $0x28] sm:$0xff]  ;;  %vm240_vm9 = vcmp.lt.s32.totalorder %v948_v42, 464 }
 0x101   :  { %vm1158_vm2 = vmand %vm174_vm6, %vm179_vm3  ;;  %vm1789_vm6 = vcmp.ge.s32.totalorder %v940_v39, 360  ;;  %vm235_vm3 = vcmp.ge.s32.totalorder %v948_v42, 456  ;;  %v1256_v13 = vmin.f32 %v490_v61, 0.5  ;;  %v1270_v31 = vmul.f32 %v1100_v57, %v1100_v57  ;;  %691 = vst.msk [vmem:[%s1704_s7 + $0x10] sm:$0xff] %vm688_vm0, %v675_v44  ;;  %v732_v40 = vld [vmem:[%s1703_s3 + $0x28] sm:$0x1] }
 0x102   :  { %v795_v60 = vpop.eup %794  ;;  %v517_v59 = vsel %vm1115_vm12, %v497_v28, %v477_v36  ;;  %vm204_vm10 = vmand %vm1789_vm6, %vm199_vm15  ;;  %v711_v36 = vld [vmem:[%s1703_s3 + $0xc] sm:$0x1]  ;;  %vm1241_vm15 = vcmp.eq.s32.totalorder %v39_v24, 0  ;;  %v470_v28 = vadd.f32 1.0, %v334_v25  ;;  %v1266_v24 = vmul.f32 %v1054_v38, %v1054_v38  ;;  %693 = vst.msk [vmem:[%s1704_s7 + $0x20] sm:$0xff] %vm688_vm0, %v677_v18 }
 0x103   :  { %418 = vrot.lane.b32.xlu0 %v795_v60, %s801_s17  ;;  %v797_v34 = vpop.eup %796  ;;  %v686_v60 = vld [vmem:[%s1703_s3 + $0x68] sm:$0xff]  ;;  %v547_v39 = vsel %vm1132_vm13, %v527_v23, %v517_v59  ;;  %vm1792_vm6 = vmor %vm1136_vm4, %vm1158_vm2  ;;  %v687_v23 = vld [vmem:[%s1703_s3 + $0x70] sm:$0xff]  ;;  %vm1272_vm4 = vcmp.eq.s32.totalorder %v40_v29, 0  ;;  %v1795_v59 = vmov 0  ;;  %vm1797_vm2 = vcmp.lt.s32.totalorder %v948_v42, 416  ;;  %694 = vst.msk [vmem:[%s1704_s7 + $0x28] sm:$0xff] %vm688_vm0, %v678_v21 }
 0x104   :  { %422 = vrot.lane.b32.xlu1 %v793_v56, %s801_s17  ;;  %v684_v56 = vld [vmem:[%s1703_s3 + $0x58] sm:$0xff]  ;;  %vm1250_vm11 = vmor %vm1792_vm6, %vm204_vm10  ;;  %v581_v61 = vmul.f32 0.5, %v547_v39  ;;  %v1796_v59 = vsel %vm1272_vm4, 4294967295, %v1795_v59  ;;  %vm1798_vm10 = vcmp.ge.s32.totalorder %v948_v42, 408  ;;  %v1284_v14 = vmin.f32 %v491_v11, 0.5  ;;  %695 = vst.msk [vmem:[%s1704_s7 + $0x30] sm:$0xff] %vm688_vm0, %v679_v46 }
 0x105   :  { %vm1280_vm6 = vmand %vm1798_vm10, %vm1797_vm2  ;;  %v720_v29 = vld [vmem:[%s1703_s3 + $0x18] sm:$0x1]  ;;  %vm1803_vm2 = vcmp.ge.s32.totalorder %v860_v5, 2  ;;  %v705_v26 = vadd.f32 23.0, %v704_v32  ;;  %696 = vst.msk [vmem:[%s1704_s7 + $0x38] sm:$0xff] %vm688_vm0, %v680_v48  ;;  %v712_v18 = vadd.f32 23.0, %v711_v36 }
 0x106   :  { %vm1296_vm8 = vmand %vm235_vm3, %vm240_vm9  ;;  %v475_v11 = vsel %vm1803_vm2, %v470_v28, %v334_v25  ;;  %v591_v47 = vsel %vm1144_vm5, %v581_v61, %v547_v39  ;;  %698 = vst.msk [vmem:[%s1704_s7 + $0x48] sm:$0xff] %vm688_vm0, %v682_v51  ;;  %vm1805_vm5 = vcmask 916480   ;;  %vm1806_vm3 = vcmp.ge.s32.totalorder %v948_v42, 504  ;;  %v738_v46 = vld [vmem:[%s1703_s3 + $0x30] sm:$0x1] }
 0x107   :  { %654 = vrot.lane.b32.xlu0 %v781_v0, %s803_s10  ;;  %v708_v0 = vld [vmem:[%s1703_s3 + $0x8] sm:$0x1]  ;;  %vm1804_vm10 = vmmov %vm1803_vm2  ;;  %v485_v25 = vmax.f32 %v475_v11, 0.0  ;;  %v1319_v32 = vmul.f32 %v475_v11, %v475_v11  ;;  %699 = vst.msk [vmem:[%s1704_s7 + $0x50] sm:$0xff] %vm688_vm0, %v683_v52  ;;  %vm706_vm2 = vcmask 57344   ;;  %v715_v9 = vadd.f32 23.0, %v714_v19 }
 0x108   :  { %420 = vrot.lane.b32.xlu1 %v797_v34, %s801_s17  ;;  %v471_v34 = vadd.f32 1.0, %v335_v27  ;;  %vm250_vm9 = vmor %vm1280_vm6, %vm1296_vm8  ;;  %700 = vst.msk [vmem:[%s1704_s7 + $0x58] sm:$0xff] %vm688_vm0, %v684_v56  ;;  %v709_v45 = vadd.f32 23.0, %v708_v0  ;;  %v718_v21 = vadd.f32 23.0, %v717_v2  ;;  %v741_v48 = vld [vmem:[%s1703_s3 + $0x34] sm:$0x1] }
 0x109   :  { %701 = vst.msk [vmem:[%s1704_s7 + $0x60] sm:$0xff] %vm688_vm0, %v685_v58  ;;  %702 = vst.msk [vmem:[%s1704_s7 + $0x68] sm:$0xff] %vm688_vm0, %v686_v60  ;;  %v495_v42 = vmin.f32 %v485_v25, 0.5  ;;  %v1809_v50 = vmov 0   ;;  %v724_v51 = vadd.f32 23.0, %v723_v55  ;;  %v727_v52 = vadd.f32 23.0, %v726_v41 }
 0x10a   :  { %v1304_v49 = vsel %vm1804_vm10, %v471_v34, %v335_v27  ;;  %703 = vst.msk [vmem:[%s1704_s7 + $0x70] sm:$0xff] %vm688_vm0, %v687_v23  ;;  %vm1398_vm0 = vmor %vm250_vm9, %vm1806_vm3  ;;  %v744_v56 = vld [vmem:[%s1703_s3 + $0x38] sm:$0x1]  ;;  %v730_v55 = vadd.f32 23.0, %v729_v20  ;;  %v733_v41 = vadd.f32 23.0, %v732_v40  ;;  %v742_v25 = vadd.f32 23.0, %v741_v48 }
 0x10b   :  { %v486_v27 = vmax.f32 %v1304_v49, 0.0  ;;  %634 = vst.msk [vmem:[%s1702_s4 + $0x20] sm:$0xff] %vm1805_vm5, %v591_v47  ;;  %v526_v44 = vmul.f32 %v1304_v49, %v1304_v49  ;;  %v735_v47 = vld [vmem:[%s1703_s3 + $0x2c] sm:$0x1]  ;;  %vm1737_vm10 = vmand %vm1250_vm11, %vm1167_vm7  ;;  %v747_v60 = vld [vmem:[%s1703_s3 + $0x3c] sm:$0x1] }
 0x10c   :  { %707 = vst.msk [vmem:[%s1704_s7 + $0x50] sm:$0x1] %vm706_vm2, %v705_v26  ;;  %vm1736_vm8 = vmand %vm1398_vm0, %vm1171_vm14  ;;  %v505_v2 = vsel %vm1737_vm10, 1, %v1809_v50  ;;  %v721_v26 = vadd.f32 23.0, %v720_v29  ;;  %v736_v39 = vadd.f32 23.0, %v735_v47  ;;  %vm1810_vm5 = vcmp.lt.s32.totalorder %v990_v62, 10 }
 0x10d   :  { %v496_v63 = vmin.f32 %v486_v27, 0.5  ;;  %710 = vst.msk [vmem:[%s1704_s7 + $0x52] sm:$0x1] %vm706_vm2, %v709_v45  ;;  %713 = vst.msk [vmem:[%s1704_s7 + $0x54] sm:$0x1] %vm706_vm2, %v712_v18  ;;  %v506_v58 = vsel %vm1736_vm8, 1, %v1809_v50  ;;  %v482_v47 = vsel %vm1810_vm5, %v891_v17, %v886_v15 }
 0x10e   :  { %vm510_vm6 = vcmp.eq.s32.totalorder %v505_v2, 1  ;;  %716 = vst.msk [vmem:[%s1704_s7 + $0x56] sm:$0x1] %vm706_vm2, %v715_v9  ;;  %719 = vst.msk [vmem:[%s1704_s7 + $0x58] sm:$0x1] %vm706_vm2, %v718_v21  ;;  %vm511_vm9 = vcmp.eq.s32.totalorder %v506_v58, 1  ;;  %v532_v2 = vmul.f32 %v482_v47, %v482_v47 }
 0x10f   :  { %v1461_v0 = vsel %vm510_vm6, %v1256_v13, %v1054_v38  ;;  %v515_v36 = vsel %vm510_vm6, %v495_v42, %v475_v11  ;;  %722 = vst.msk [vmem:[%s1704_s7 + $0x5a] sm:$0x1] %vm706_vm2, %v721_v26  ;;  %725 = vst.msk [vmem:[%s1704_s7 + $0x5c] sm:$0x1] %vm706_vm2, %v724_v51  ;;  %v750_v38 = vld [vmem:[%s1703_s3 + $0x40] sm:$0x1]  ;;  %v1483_v28 = vsel %vm511_vm9, %v1284_v14, %v1100_v57  ;;  %v415_v51 = vpop.permute.xlu0 %414 }
 0x110   :  { %728 = vst.msk [vmem:[%s1704_s7 + $0x5e] sm:$0x1] %vm706_vm2, %v727_v52  ;;  %v753_v13 = vld [vmem:[%s1703_s3 + $0x44] sm:$0x1]  ;;  %v550_v34 = vsel %vm1241_vm15, %v1266_v24, %v1461_v0  ;;  %v516_v23 = vsel %vm511_vm9, %v496_v63, %v1304_v49  ;;  %v545_v19 = vsel %vm1241_vm15, %v1319_v32, %v515_v36  ;;  %731 = vst.msk [vmem:[%s1704_s7 + $0x60] sm:$0x1] %vm706_vm2, %v730_v55 }
 0x111   :  { %734 = vst.msk [vmem:[%s1704_s7 + $0x62] sm:$0x1] %vm706_vm2, %v733_v41  ;;  %v756_v14 = vld [vmem:[%s1703_s3 + $0x48] sm:$0x1]  ;;  %v759_v49 = vld [vmem:[%s1703_s3 + $0x4c] sm:$0x1]  ;;  %v551_v61 = vsel %vm1272_vm4, %v1270_v31, %v1483_v28  ;;  %v546_v29 = vsel %vm1272_vm4, %v526_v44, %v516_v23  ;;  %vm1811_vm3 = vmmov %vm1810_vm5 }
 0x112   :  { %v762_v57 = vld [vmem:[%s1703_s3 + $0x50] sm:$0x1]  ;;  %631 = vst [vmem:[%s1702_s4 + $0x10] sm:$0xff] %v545_v19  ;;  %737 = vst.msk [vmem:[%s1704_s7 + $0x64] sm:$0x1] %vm706_vm2, %v736_v39  ;;  %v739_v11 = vadd.f32 23.0, %v738_v46  ;;  %v478_v42 = vsel %vm1811_vm3, %v858_v4, %v847_v1 }
 0x113   :  { %632 = vst [vmem:[%s1702_s4 + $0x18] sm:$0xff] %v546_v29  ;;  %v745_v27 = vadd.f32 23.0, %v744_v56  ;;  %v748_v32 = vadd.f32 23.0, %v747_v60  ;;  %v751_v20 = vadd.f32 23.0, %v750_v38  ;;  %v754_v40 = vadd.f32 23.0, %v753_v13  ;;  %vm1812_vm6 = vmmov %vm1811_vm3  ;;  %v1817_v55 = vld [vmem:[#allocation3_spill] sm:$0xff] }
 0x114   :  { %740 = vst.msk [vmem:[%s1704_s7 + $0x66] sm:$0x1] %vm706_vm2, %v739_v11  ;;  %743 = vst.msk [vmem:[%s1704_s7 + $0x68] sm:$0x1] %vm706_vm2, %v742_v25  ;;  %v757_v44 = vadd.f32 23.0, %v756_v14  ;;  %v760_v45 = vadd.f32 23.0, %v759_v49  ;;  %v479_v9 = vsel %vm1812_vm6, %v863_v7, %v855_v3  ;;  %v528_v17 = vmul.f32 %v478_v42, %v478_v42 }
 0x115   :  { %v763_v18 = vadd.f32 23.0, %v762_v57  ;;  %746 = vst.msk [vmem:[%s1704_s7 + $0x6a] sm:$0x1] %vm706_vm2, %v745_v27  ;;  %749 = vst.msk [vmem:[%s1704_s7 + $0x6c] sm:$0x1] %vm706_vm2, %v748_v32  ;;  %v492_v63 = vmax.f32 %v482_v47, 0.0  ;;  %v529_v52 = vmul.f32 %v479_v9, %v479_v9  ;;  %v439_v3 = vmul.f32 %v916_v30, %v916_v30 }
 0x116   :  { %752 = vst.msk [vmem:[%s1704_s7 + $0x6e] sm:$0x1] %vm706_vm2, %v751_v20  ;;  %755 = vst.msk [vmem:[%s1704_s7 + $0x70] sm:$0x1] %vm706_vm2, %v754_v40  ;;  %v488_v21 = vmax.f32 %v478_v42, 0.0  ;;  %v489_v46 = vmax.f32 %v479_v9, 0.0  ;;  %vm1814_vm3 = vnez %v1748_v53  ;;  %v443_v41 = vmul.f32 %v1817_v55, %v1817_v55 }
 0x117   :  { %758 = vst.msk [vmem:[%s1704_s7 + $0x72] sm:$0x1] %vm706_vm2, %v757_v44  ;;  %761 = vst.msk [vmem:[%s1704_s7 + $0x74] sm:$0x1] %vm706_vm2, %v760_v45  ;;  %v502_v48 = vmin.f32 %v492_v63, 0.5  ;;  %vm1813_vm9 = vcmp.eq.s32.totalorder %v1009_v10, 1 }
 0x118   :  { %764 = vst.msk [vmem:[%s1704_s7 + $0x76] sm:$0x1] %vm706_vm2, %v763_v18  ;;  %v498_v50 = vmin.f32 %v488_v21, 0.5  ;;  %v499_v26 = vmin.f32 %v489_v46, 0.5  ;;  %vm1738_vm2 = vcmask 973824   ;;  %v601_v4 = vsub.s32 0, %v860_v5  ;;  %vm1815_vm6 = vmand %vm972_vm1, %vm1814_vm3 }
 0x119   :  { %v522_v15 = vsel %vm1115_vm12, %v502_v48, %v482_v47  ;;  %vm554_vm5 = vcmp.lt.s32.totalorder %v990_v62, 11  ;;  %vm649_vm8 = vcmp.ge.s32.totalorder %v888_v16, 43  ;;  %vm650_vm10 = vcmp.lt.s32.totalorder %v888_v16, 47  ;;  %v1818_v60 = vld [vmem:[#allocation7_spill] sm:$0xff]  ;;  %v1822_v23 = vld [vmem:[#allocation9_spill] sm:$0xff]  ;;  %v1826_v57 = vld [vmem:[#allocation8_spill] sm:$0xff] }
 0x11a   :  { %v518_v1 = vsel %vm1813_vm9, %v498_v50, %v478_v42  ;;  %v552_v58 = vsel %vm1132_vm13, %v532_v2, %v522_v15  ;;  %vm1816_vm9 = vnez %v1759_v33  ;;  %vm1821_vm1 = vcmask 973824   ;;  %v1831_v44 = vld [vmem:[#allocation5_spill] sm:$0xff]  ;;  %v1832_v18 = vld [vmem:[#allocation6_spill] sm:$0xff] }
 0x11b   :  { %v519_v5 = vsel %vm1816_vm9, %v499_v26, %v479_v9  ;;  %vm1823_vm3 = vnez %v1822_v23  ;;  %v586_v14 = vmul.f32 0.5, %v552_v58  ;;  %vm1827_vm4 = vnez %v1826_v57 }
 0x11c   :  { %v549_v29 = vsel %vm1827_vm4, %v529_v52, %v519_v5  ;;  %v441_v45 = vmul.f32 %v1831_v44, %v1831_v44  ;;  %v442_v47 = vmul.f32 %v1832_v18, %v1832_v18 }
 0x172   :  { %v417_v56 = vpop.permute.xlu1 %416 }
 0x173   :  { %v425_v7 = vsel %vm1738_vm2, %v415_v51, %v417_v56  ;;  %vm1819_vm2 = vnez %v1818_v60 }
 0x174   :  { %v434_v10 = vsel %vm1815_vm6, %v425_v7, %v916_v30  ;;  %v548_v36 = vsel %vm1819_vm2, %v528_v17, %v518_v1  ;;  %v1820_v30 = vld [vmem:[#allocation4_spill] sm:$0xff]  ;;  %vm1607_vm6 = vmand %vm554_vm5, %vm1823_vm3  ;;  %vm1830_vm5 = vcmp.eq.s32.totalorder %v990_v62, 8 }
 0x175   :  { %v444_v53 = vsel %vm1819_vm2, %v439_v3, %v434_v10  ;;  %v419_v54 = vpop.permute.xlu0 %418  ;;  %v440_v39 = vmul.f32 %v1820_v30, %v1820_v30  ;;  %vm1623_vm2 = vmand %vm649_vm8, %vm650_vm10  ;;  %v596_v42 = vsel %vm1607_vm6, %v586_v14, %v552_v58  ;;  %vm639_vm10 = vcmask 912384  }
 0x176   :  { %v602_v38 = vrot.slane %v444_v53, %v601_v4  ;;  %v426_v13 = vsel %vm1821_vm1, %v417_v56, %v419_v54  ;;  %v423_v49 = vpop.permute.xlu1 %422  ;;  %vm1837_vm8 = vmand %vm1250_vm11, %vm1167_vm7 }
 0x177   :  { %v435_v11 = vsel %vm1816_vm9, %v426_v13, %v1820_v30  ;;  %v438_v25 = vsel %vm1115_vm12, %v423_v49, %v1817_v55  ;;  %vm658_vm9 = vcmask 390144   ;;  %vm1834_vm12 = vmmov %vm1830_vm5 }
 0x178   :  { %v624_v32 = vsel %vm1830_vm5, %v602_v38, %v548_v36  ;;  %v445_v20 = vsel %vm1827_vm4, %v440_v39, %v435_v11  ;;  %v448_v33 = vsel %vm1132_vm13, %v443_v41, %v438_v25  ;;  %vm1835_vm13 = vmmov %vm1821_vm1 }
 0x179   :  { %635 = vst [vmem:[%s1702_s4 + $0x28] sm:$0xf] %v624_v32  ;;  %v606_v22 = vrot.slane %v445_v20, %v601_v4  ;;  %v453_v16 = vmul.f32 0.5, %v448_v33  ;;  %v655_v40 = vpop.permute.xlu0 %654  ;;  %vm1836_vm4 = vmmov %vm1821_vm1 }
 0x17a   :  { %v421_v63 = vpop.permute.xlu1 %420  ;;  %v657_v9 = vsel %vm1623_vm2, %v655_v40, %v1833_v12  ;;  %vm1838_vm1 = vmand %vm1398_vm0, %vm1171_vm14 }
 0x17b   :  { %v625_v21 = vsel %vm1834_vm12, %v606_v22, %v549_v29  ;;  %v458_v46 = vsel %vm1823_vm3, %v453_v16, %v448_v33  ;;  %v427_v48 = vsel %vm1835_vm13, %v419_v54, %v421_v63  ;;  %v428_v50 = vsel %vm1836_vm4, %v421_v63, %v423_v49  ;;  %659 = vst.msk [vmem:[%s1705_s5] sm:$0x3f] %vm658_vm9, %v657_v9  ;;  %vm1840_vm6 = vmmov %vm1830_vm5 }
 0x17c   :  { %636 = vst [vmem:[%s1702_s4 + $0x30] sm:$0xf] %v625_v21  ;;  %v618_v2 = vrot.slane %v458_v46, %v601_v4  ;;  %v436_v26 = vsel %vm1837_vm8, %v427_v48, %v1831_v44  ;;  %v437_v15 = vsel %vm1838_vm1, %v428_v50, %v1832_v18  ;;  %vm1839_vm3 = vnez %v1796_v59  ;;  %vm1841_vm7 = vmmov %vm1830_vm5 }
 0x17d   :  { %v446_v17 = vsel %vm1241_vm15, %v441_v45, %v436_v26  ;;  %v447_v51 = vsel %vm1839_vm3, %v442_v47, %v437_v15  ;;  %vm1842_vm11 = vmmov %vm1830_vm5 }
 0x17e   :  { %v628_v8 = vsel %vm1840_vm6, %v618_v2, %v596_v42  ;;  %v610_v52 = vrot.slane %v446_v17, %v601_v4  ;;  %v614_v35 = vrot.slane %v447_v51, %v601_v4 }
 0x17f   :  { %640 = vst.msk [vmem:[%s1702_s4 + $0x48] sm:$0xf] %vm639_vm10, %v628_v8 }
 0x180   :  { %v626_v37 = vsel %vm1841_vm7, %v610_v52, %v550_v34  ;;  %v627_v43 = vsel %vm1842_vm11, %v614_v35, %v551_v61 }
 0x181   :  { %637 = vst [vmem:[%s1702_s4 + $0x38] sm:$0xf] %v626_v37  ;;  %638 = vst [vmem:[%s1702_s4 + $0x40] sm:$0xf] %v627_v43 }

</bundles_post_ra>
